<compile_context>
chip_gen: v7x
topology: tpu7x:2x2x1
jax: 0.10.0
libtpu: 0.0.40
codegen_flags: <defaults>
</compile_context>

<pallas_src>
import functools

import jax
import jax.numpy as jnp
from jax.experimental import pallas as pl
from jax.experimental.pallas import tpu as pltpu


def dqn_kernel(x_ref, w1_ref, b1_ref, w2_ref, b2_ref, w3_ref, b3_ref,
               wh_ref, bh_ref, out_ref, *, action_size):
    # Dots run on the MXU in the (bf16) storage dtype with f32 accumulation;
    # bias add / ReLU / mean / combine are done in f32 on the VPU.
    x = x_ref[...]

    z1 = jnp.maximum(
        jnp.dot(x, w1_ref[...], preferred_element_type=jnp.float32)
        + b1_ref[...], 0.0)
    z2 = jnp.maximum(
        jnp.dot(z1.astype(w2_ref.dtype), w2_ref[...],
                preferred_element_type=jnp.float32) + b2_ref[...], 0.0)
    z3 = jnp.maximum(
        jnp.dot(z2.astype(w3_ref.dtype), w3_ref[...],
                preferred_element_type=jnp.float32) + b3_ref[...], 0.0)

    # Fused VA||VS head: one matmul, then slice.
    y = jnp.dot(z3.astype(wh_ref.dtype), wh_ref[...],
                preferred_element_type=jnp.float32) + bh_ref[...]
    va = y[:, :action_size]
    vs = y[:, action_size:action_size + 1]

    # torch.mean(va, dim=1, keepdim=True) — over the true action columns only.
    avg_va = jnp.mean(va, axis=1, keepdims=True)
    out_ref[...] = vs + (va - avg_va)


def double_dueling_dqn(x, params, *, block_b=128, compute_dtype=jnp.bfloat16):
    """x: [B, state_size] float32; params: dict of transposed weights/biases."""
    B, state_size = x.shape
    action_size = params["wva"].shape[1]

    # Fuse the two heads into a single [16, action_size + 1] matmul.
    wh = jnp.concatenate([params["wva"], params["wvs"]], axis=1)
    bh = jnp.concatenate([params["bva"], params["bvs"]], axis=1)

    # MXU operands in bf16 (halves HBM traffic for x, the only B-scaling
    # array); biases stay f32 for the f32 epilogue.
    xc = x.astype(compute_dtype)
    w1 = params["w1"].astype(compute_dtype)
    w2 = params["w2"].astype(compute_dtype)
    w3 = params["w3"].astype(compute_dtype)
    wh = wh.astype(compute_dtype)
    b1, b2, b3 = params["b1"], params["b2"], params["b3"]

    # Batch tile: block_b rows per grid step (multiple of 8). If B is smaller
    # than a tile the block just covers the whole array. Pad B up to a tile
    # multiple (rows are independent) and slice the result back.
    tb = min(block_b, B)
    pad = (-B) % tb
    if pad:
        xc = jnp.pad(xc, ((0, pad), (0, 0)))
    b_padded = B + pad
    nb = b_padded // tb

    def resident(arr):
        # Whole-array block, same block every grid step -> stays in VMEM.
        return pl.BlockSpec(arr.shape, lambda i: (0, 0))

    out = pl.pallas_call(
        functools.partial(dqn_kernel, action_size=action_size),
        out_shape=jax.ShapeDtypeStruct((b_padded, action_size), jnp.float32),
        grid=(nb,),
        in_specs=[
            pl.BlockSpec((tb, state_size), lambda i: (i, 0)),  # x: pipelined
            resident(w1), resident(b1),
            resident(w2), resident(b2),
            resident(w3), resident(b3),
            resident(wh), resident(bh),
        ],
        out_specs=pl.BlockSpec((tb, action_size), lambda i: (i, 0)),
        compiler_params=pltpu.CompilerParams(
            dimension_semantics=("parallel",)),  # megacore on v7x
    )(xc, w1, b1, w2, b2, w3, b3, wh, bh)

    if pad:
        out = out[:B]
    return out


def init_params(key, state_size, action_size):
    """Deterministic init mimicking nn.Linear's U(-1/sqrt(fan_in), +1/sqrt(fan_in)).

    Weights stored transposed [in_features, out_features]; biases [1, out].
    """
    dims = [("w1", "b1", state_size, 64),
            ("w2", "b2", 64, 32),
            ("w3", "b3", 32, 16),
            ("wva", "bva", 16, action_size),
            ("wvs", "bvs", 16, 1)]
    params = {}
    for wname, bname, fan_in, fan_out in dims:
        key, kw, kb = jax.random.split(key, 3)
        bound = 1.0 / jnp.sqrt(jnp.float32(fan_in))
        params[wname] = jax.random.uniform(
            kw, (fan_in, fan_out), jnp.float32, -bound, bound)
        params[bname] = jax.random.uniform(
            kb, (1, fan_out), jnp.float32, -bound, bound)
    return params


def reference_forward(x, p, compute_dtype=jnp.bfloat16):
    """Pure-JAX reference with the same bf16-MXU / f32-epilogue recipe."""
    cd = compute_dtype

    def lin(a, w, b):
        return jnp.dot(a.astype(cd), w.astype(cd),
                       preferred_element_type=jnp.float32) + b

    z1 = jnp.maximum(lin(x, p["w1"], p["b1"]), 0.0)
    z2 = jnp.maximum(lin(z1, p["w2"], p["b2"]), 0.0)
    z3 = jnp.maximum(lin(z2, p["w3"], p["b3"]), 0.0)
    va = lin(z3, p["wva"], p["bva"])
    vs = lin(z3, p["wvs"], p["bvs"])
    return vs + (va - jnp.mean(va, axis=1, keepdims=True))


if __name__ == "__main__":
    key = jax.random.PRNGKey(0)
    state_size, action_size, batch = 16, 4, 256  # batch > block_b exercises the grid

    kx, kp = jax.random.split(key)
    x = jax.random.normal(kx, (batch, state_size), jnp.float32)
    params = init_params(kp, state_size, action_size)

    out = double_dueling_dqn(x, params, block_b=128)
    out = jax.block_until_ready(out)

    ref = reference_forward(x, params)
    assert out.shape == (batch, action_size)
    assert jnp.allclose(out, ref, atol=2e-3, rtol=2e-3), "mismatch vs reference"

    print("KERNEL_OK")
</pallas_src>

<mosaic_0001>
module attributes {stable_mosaic.version = 11 : i64} {
  func.func @dqn_kernel(%arg0: i32, %arg1: memref<128x16xbf16, #tpu.memory_space<vmem>>, %arg2: memref<16x64xbf16, #tpu.memory_space<vmem>>, %arg3: memref<1x64xf32, #tpu.memory_space<vmem>>, %arg4: memref<64x32xbf16, #tpu.memory_space<vmem>>, %arg5: memref<1x32xf32, #tpu.memory_space<vmem>>, %arg6: memref<32x16xbf16, #tpu.memory_space<vmem>>, %arg7: memref<1x16xf32, #tpu.memory_space<vmem>>, %arg8: memref<16x5xbf16, #tpu.memory_space<vmem>>, %arg9: memref<1x5xf32, #tpu.memory_space<vmem>>, %arg10: memref<128x4xf32, #tpu.memory_space<vmem>>) attributes {dimension_semantics = [#tpu.dimension_semantics<parallel>], iteration_bounds = array<i64: 2>, scalar_prefetch = 0 : i64, scratch_operands = 0 : i64, tpu.core_type = #tpu.core_type<tc>, window_params = [{transform_indices = @transform_0, window_bounds = array<i64: 128, 16>}, {pipeline_mode = #tpu.pipeline_mode<synchronous>, transform_indices = @transform_1, window_bounds = array<i64: 16, 64>}, {pipeline_mode = #tpu.pipeline_mode<synchronous>, transform_indices = @transform_2, window_bounds = array<i64: 1, 64>}, {pipeline_mode = #tpu.pipeline_mode<synchronous>, transform_indices = @transform_3, window_bounds = array<i64: 64, 32>}, {pipeline_mode = #tpu.pipeline_mode<synchronous>, transform_indices = @transform_4, window_bounds = array<i64: 1, 32>}, {pipeline_mode = #tpu.pipeline_mode<synchronous>, transform_indices = @transform_5, window_bounds = array<i64: 32, 16>}, {pipeline_mode = #tpu.pipeline_mode<synchronous>, transform_indices = @transform_6, window_bounds = array<i64: 1, 16>}, {pipeline_mode = #tpu.pipeline_mode<synchronous>, transform_indices = @transform_7, window_bounds = array<i64: 16, 5>}, {pipeline_mode = #tpu.pipeline_mode<synchronous>, transform_indices = @transform_8, window_bounds = array<i64: 1, 5>}, {transform_indices = @transform_9, window_bounds = array<i64: 128, 4>}]} {
    %c0 = arith.constant 0 : index
    %c0_0 = arith.constant 0 : index
    %0 = vector.load %arg1[%c0, %c0_0] : memref<128x16xbf16, #tpu.memory_space<vmem>>, vector<128x16xbf16>
    %c0_1 = arith.constant 0 : index
    %c0_2 = arith.constant 0 : index
    %1 = vector.load %arg2[%c0_1, %c0_2] : memref<16x64xbf16, #tpu.memory_space<vmem>>, vector<16x64xbf16>
    %cst = arith.constant dense<0.000000e+00> : vector<128x64xf32>
    %2 = tpu.matmul %0, %1, %cst {dimension_numbers = #tpu.dot_dimension_numbers<[1], [0], [0], [1], [0, 0, 1, 1], [], []>} : vector<128x16xbf16>, vector<16x64xbf16>, vector<128x64xf32> -> vector<128x64xf32>
    %c0_3 = arith.constant 0 : index
    %c0_4 = arith.constant 0 : index
    %3 = vector.load %arg3[%c0_3, %c0_4] : memref<1x64xf32, #tpu.memory_space<vmem>>, vector<1x64xf32>
    %4 = vector.broadcast %3 : vector<1x64xf32> to vector<128x64xf32>
    %5 = arith.addf %2, %4 : vector<128x64xf32>
    %cst_5 = arith.constant 0.000000e+00 : f32
    %6 = vector.broadcast %cst_5 : f32 to vector<128x64xf32>
    %7 = arith.maximumf %5, %6 : vector<128x64xf32>
    %8 = arith.truncf %7 : vector<128x64xf32> to vector<128x64xbf16>
    %c0_6 = arith.constant 0 : index
    %c0_7 = arith.constant 0 : index
    %9 = vector.load %arg4[%c0_6, %c0_7] : memref<64x32xbf16, #tpu.memory_space<vmem>>, vector<64x32xbf16>
    %cst_8 = arith.constant dense<0.000000e+00> : vector<128x32xf32>
    %10 = tpu.matmul %8, %9, %cst_8 {dimension_numbers = #tpu.dot_dimension_numbers<[1], [0], [0], [1], [0, 0, 1, 1], [], []>} : vector<128x64xbf16>, vector<64x32xbf16>, vector<128x32xf32> -> vector<128x32xf32>
    %c0_9 = arith.constant 0 : index
    %c0_10 = arith.constant 0 : index
    %11 = vector.load %arg5[%c0_9, %c0_10] : memref<1x32xf32, #tpu.memory_space<vmem>>, vector<1x32xf32>
    %12 = vector.broadcast %11 : vector<1x32xf32> to vector<128x32xf32>
    %13 = arith.addf %10, %12 : vector<128x32xf32>
    %cst_11 = arith.constant 0.000000e+00 : f32
    %14 = vector.broadcast %cst_11 : f32 to vector<128x32xf32>
    %15 = arith.maximumf %13, %14 : vector<128x32xf32>
    %16 = arith.truncf %15 : vector<128x32xf32> to vector<128x32xbf16>
    %c0_12 = arith.constant 0 : index
    %c0_13 = arith.constant 0 : index
    %17 = vector.load %arg6[%c0_12, %c0_13] : memref<32x16xbf16, #tpu.memory_space<vmem>>, vector<32x16xbf16>
    %cst_14 = arith.constant dense<0.000000e+00> : vector<128x16xf32>
    %18 = tpu.matmul %16, %17, %cst_14 {dimension_numbers = #tpu.dot_dimension_numbers<[1], [0], [0], [1], [0, 0, 1, 1], [], []>} : vector<128x32xbf16>, vector<32x16xbf16>, vector<128x16xf32> -> vector<128x16xf32>
    %c0_15 = arith.constant 0 : index
    %c0_16 = arith.constant 0 : index
    %19 = vector.load %arg7[%c0_15, %c0_16] : memref<1x16xf32, #tpu.memory_space<vmem>>, vector<1x16xf32>
    %20 = vector.broadcast %19 : vector<1x16xf32> to vector<128x16xf32>
    %21 = arith.addf %18, %20 : vector<128x16xf32>
    %cst_17 = arith.constant 0.000000e+00 : f32
    %22 = vector.broadcast %cst_17 : f32 to vector<128x16xf32>
    %23 = arith.maximumf %21, %22 : vector<128x16xf32>
    %24 = arith.truncf %23 : vector<128x16xf32> to vector<128x16xbf16>
    %c0_18 = arith.constant 0 : index
    %c0_19 = arith.constant 0 : index
    %25 = vector.load %arg8[%c0_18, %c0_19] : memref<16x5xbf16, #tpu.memory_space<vmem>>, vector<16x5xbf16>
    %cst_20 = arith.constant dense<0.000000e+00> : vector<128x5xf32>
    %26 = tpu.matmul %24, %25, %cst_20 {dimension_numbers = #tpu.dot_dimension_numbers<[1], [0], [0], [1], [0, 0, 1, 1], [], []>} : vector<128x16xbf16>, vector<16x5xbf16>, vector<128x5xf32> -> vector<128x5xf32>
    %c0_21 = arith.constant 0 : index
    %c0_22 = arith.constant 0 : index
    %27 = vector.load %arg9[%c0_21, %c0_22] : memref<1x5xf32, #tpu.memory_space<vmem>>, vector<1x5xf32>
    %28 = vector.broadcast %27 : vector<1x5xf32> to vector<128x5xf32>
    %29 = arith.addf %26, %28 : vector<128x5xf32>
    %30 = vector.extract_strided_slice %29 {offsets = [0, 0], sizes = [128, 4], strides = [1, 1]} : vector<128x5xf32> to vector<128x4xf32>
    %31 = vector.extract_strided_slice %29 {offsets = [0, 4], sizes = [128, 1], strides = [1, 1]} : vector<128x5xf32> to vector<128x1xf32>
    %cst_23 = arith.constant dense<0.000000e+00> : vector<128xf32>
    %32 = vector.multi_reduction <add>, %30, %cst_23 [1] : vector<128x4xf32> to vector<128xf32>
    %33 = vector.shape_cast %32 : vector<128xf32> to vector<128x1xf32>
    %cst_24 = arith.constant 4.000000e+00 : f32
    %34 = vector.broadcast %cst_24 : f32 to vector<128x1xf32>
    %35 = arith.divf %33, %34 : vector<128x1xf32>
    %36 = vector.broadcast %35 : vector<128x1xf32> to vector<128x4xf32>
    %37 = arith.subf %30, %36 : vector<128x4xf32>
    %38 = vector.broadcast %31 : vector<128x1xf32> to vector<128x4xf32>
    %39 = arith.addf %38, %37 : vector<128x4xf32>
    %c0_25 = arith.constant 0 : index
    %c0_26 = arith.constant 0 : index
    %40 = vector.load %arg10[%c0_25, %c0_26] : memref<128x4xf32, #tpu.memory_space<vmem>>, vector<128x4xf32>
    tpu.vector_store %arg10[%c0_25, %c0_26], %39 {strides = array<i32>} : memref<128x4xf32, #tpu.memory_space<vmem>>, vector<128x4xf32>,
    return
  }
  func.func @transform_0(%arg0: i32) -> (i32, i32) {
    %c0_i32 = arith.constant 0 : i32
    %c0_i32_0 = arith.constant 0 : i32
    return %arg0, %c0_i32 : i32, i32
  }
  func.func @transform_1(%arg0: i32) -> (i32, i32) {
    %c0_i32 = arith.constant 0 : i32
    %c0_i32_0 = arith.constant 0 : i32
    %c0_i32_1 = arith.constant 0 : i32
    return %c0_i32, %c0_i32_0 : i32, i32
  }
  func.func @transform_2(%arg0: i32) -> (i32, i32) {
    %c0_i32 = arith.constant 0 : i32
    %c0_i32_0 = arith.constant 0 : i32
    %c0_i32_1 = arith.constant 0 : i32
    return %c0_i32, %c0_i32_0 : i32, i32
  }
  func.func @transform_3(%arg0: i32) -> (i32, i32) {
    %c0_i32 = arith.constant 0 : i32
    %c0_i32_0 = arith.constant 0 : i32
    %c0_i32_1 = arith.constant 0 : i32
    return %c0_i32, %c0_i32_0 : i32, i32
  }
  func.func @transform_4(%arg0: i32) -> (i32, i32) {
    %c0_i32 = arith.constant 0 : i32
    %c0_i32_0 = arith.constant 0 : i32
    %c0_i32_1 = arith.constant 0 : i32
    return %c0_i32, %c0_i32_0 : i32, i32
  }
  func.func @transform_5(%arg0: i32) -> (i32, i32) {
    %c0_i32 = arith.constant 0 : i32
    %c0_i32_0 = arith.constant 0 : i32
    %c0_i32_1 = arith.constant 0 : i32
    return %c0_i32, %c0_i32_0 : i32, i32
  }
  func.func @transform_6(%arg0: i32) -> (i32, i32) {
    %c0_i32 = arith.constant 0 : i32
    %c0_i32_0 = arith.constant 0 : i32
    %c0_i32_1 = arith.constant 0 : i32
    return %c0_i32, %c0_i32_0 : i32, i32
  }
  func.func @transform_7(%arg0: i32) -> (i32, i32) {
    %c0_i32 = arith.constant 0 : i32
    %c0_i32_0 = arith.constant 0 : i32
    %c0_i32_1 = arith.constant 0 : i32
    return %c0_i32, %c0_i32_0 : i32, i32
  }
  func.func @transform_8(%arg0: i32) -> (i32, i32) {
    %c0_i32 = arith.constant 0 : i32
    %c0_i32_0 = arith.constant 0 : i32
    %c0_i32_1 = arith.constant 0 : i32
    return %c0_i32, %c0_i32_0 : i32, i32
  }
  func.func @transform_9(%arg0: i32) -> (i32, i32) {
    %c0_i32 = arith.constant 0 : i32
    %c0_i32_0 = arith.constant 0 : i32
    return %arg0, %c0_i32 : i32, i32
  }
}

</mosaic_0001>

<bundles_post_ra>
// kernel: tpu_custom_call.1
= control target key start
LH: loop header
LB: loop body
LE: loop exit
PB: predicated region body
PF: predicated region fallthrough
CT: control target
= control target key end

     0   :  { %s1563_s30 = smov 0   ;;  %s1777_s0 = inlined_call_operand.vmem [shape: bf16[256,16], index: 0, kind: input, shape index: {}]   ;;  %s1778_s1 = inlined_call_operand.vmem [shape: bf16[16,64], index: 1, kind: input, shape index: {}]   ;;  %s1779_s2 = inlined_call_operand.vmem [shape: f32[1,64], index: 2, kind: input, shape index: {}]   ;;  %s1780_s3 = inlined_call_operand.vmem [shape: bf16[64,32], index: 3, kind: input, shape index: {}]   ;;  %s1781_s4 = inlined_call_operand.vmem [shape: f32[1,32], index: 4, kind: input, shape index: {}]   ;;  %s1782_s5 = inlined_call_operand.vmem [shape: bf16[32,16], index: 5, kind: input, shape index: {}]   ;;  %s1783_s6 = inlined_call_operand.vmem [shape: f32[1,16], index: 6, kind: input, shape index: {}]   ;;  %s1784_s7 = inlined_call_operand.vmem [shape: bf16[16,5], index: 7, kind: input, shape index: {}]   ;;  %s1785_s8 = inlined_call_operand.vmem [shape: f32[1,5], index: 8, kind: input, shape index: {}]   ;;  %s1786_s9 = inlined_call_operand.vmem [shape: f32[256,4], index: 9, kind: output, shape index: {}]  }
   0x1 LB: > { %s1294_s10 = sadd.s32 4294967295, %s1510_s30   ;;  %p1298_p0 = scmp.ge.s32.totalorder %s1510_s30, 1  ;;  %s1510_s30 = sphi %s1563_s30, %s19_s30  }
   0x2   : > { %p288_p1 = scmp.lt.s32.totalorder %s1510_s30, 3 }
   0x4   : > { %p289_p2 = pnand %p1298_p0, %p288_p1 }
   0x5   : > { %v1488_v0 = vld [vmem:[%s1778_s1] sm:$0xff] (!%p289_p2)   ;;  %s1299_s13 = sshll.u32 (!%p289_p2), %s1294_s10, 4  ;;  %v1498_v2 = vld [vmem:[%s1780_s3 + $0x8] sm:$0xff] (!%p289_p2)   ;;  %vm408_vm0 = vcmask (!%p289_p2), 130048   ;;  %v1499_v11 = vld [vmem:[%s1780_s3 + $0x10] sm:$0xff] (!%p289_p2)   ;;  %vm593_vm1 = vcmask (!%p289_p2), 523264  }
   0x6   : > { %292 = sbr.rel (%p289_p2) target bundleno = 1372 (0x55c), region = 56  ;;  %p325_p3 = scmp.lt.s32.totalorder (!%p289_p2), %s1299_s13, 31  ;;  %1397 = vmatprep.subr.bf16.mxu0 (!%p289_p2), %v1488_v0  ;;  %v1497_v1 = vld [vmem:[%s1780_s3] sm:$0xff] (!%p289_p2)   ;;  %v1500_v12 = vld [vmem:[%s1780_s3 + $0x18] sm:$0xff] (!%p289_p2)   ;;  %v1502_v14 = vld [vmem:[%s1782_s5 + $0x8] sm:$0xff] (!%p289_p2)   ;;  %vm762_vm2 = vcmask (!%p289_p2), 261120  }
   0x7   : > { %1398 = vmatpush3.bf16.msra.mxu0 (!%p289_p2), %v1488_v0  ;;  %1415 = vmatprep.subr.bf16.mxu1 (!%p289_p2), %v1497_v1  ;;  %v1501_v13 = vld [vmem:[%s1782_s5] sm:$0xff] (!%p289_p2)   ;;  %vm1044_vm3 = vcmask (!%p289_p2), 31744  }
   0x8   : > { %1416 = vmatpush3.bf16.msra.mxu1 (!%p289_p2), %v1497_v1  ;;  %1439 = vmatprep.subr.bf16.mxu0 (!%p289_p2), %v1501_v13  ;;  %v1303_v15 = vld [vmem:[%s1779_s2] ss:$0 sm:$0xff] (!%p289_p2) }
   0x9   : > { %1417 = vmatprep.subr.bf16.mxu1 (!%p289_p2), %v1498_v2 }
   0xc   : > { %1418 = vmatpush3.bf16.msra.mxu1 (!%p289_p2), %v1498_v2 }
   0xd   : > { %s1788_s13 = smov (!%p325_p3, %s1299_s13), 31  ;;  %1419 = vmatprep.subr.bf16.mxu1 %v1499_v11 }
   0xe   : > { %s1300_s18 = sshll.u32 %s1788_s13, 2 }
   0xf   : > { %s328_s21 = scalar_lea.vmem %s1777_s0, %s1300_s18 }
  0x10   : > { %v1489_v3 = vld [vmem:[%s328_s21] sm:$0xff]   ;;  %v1490_v4 = vld [vmem:[%s328_s21 + $0x8] sm:$0xff]   ;;  %v1491_v5 = vld [vmem:[%s328_s21 + $0x10] sm:$0xff]   ;;  %1420 = vmatpush3.bf16.msra.mxu1 %v1499_v11 }
  0x11   : > { %1399 = vmatprep.mubr.msk.bf16.mxu0 %vm408_vm0, %v1489_v3  ;;  %v1492_v6 = vld [vmem:[%s328_s21 + $0x18] sm:$0xff]   ;;  %v1493_v7 = vld [vmem:[%s328_s21 + $0x20] sm:$0xff]   ;;  %v1494_v8 = vld [vmem:[%s328_s21 + $0x28] sm:$0xff]   ;;  %1421 = vmatprep.subr.bf16.mxu1 %v1500_v12 }
  0x12   : > { %1400 = vmatmul.mubr.msk.bf16.vlgmr.msra.gmra.mrb[0].mxu0 %vm408_vm0, %v1490_v4  ;;  %v1495_v9 = vld [vmem:[%s328_s21 + $0x30] sm:$0xff]   ;;  %v1496_v10 = vld [vmem:[%s328_s21 + $0x38] sm:$0xff]   ;;  %s1302_s21 = sshll.u32 %s1788_s13, 3 }
  0x13   : > { %1403 = vmatprep.mubr.msk.bf16.mxu0 %vm408_vm0, %v1491_v5  ;;  %1440 = vmatpush3.bf16.msra.mxu0 %v1501_v13  ;;  %s1712_s24 = scalar_lea.vmem %s1786_s9, %s1302_s21 }
  0x14   : > { %1422 = vmatpush3.bf16.msra.mxu1 %v1500_v12  ;;  %1441 = vmatprep.subr.bf16.mxu0 %v1502_v14 }
  0x17   : > { %1442 = vmatpush3.bf16.msra.mxu0 %v1502_v14 }
  0x1a   : > { %1404 = vmatmul.mubr.msk.bf16.gmra.mrb[4].mxu0 %vm408_vm0, %v1492_v6 }
  0x1b   : > { %1407 = vmatprep.mubr.msk.bf16.mxu0 %vm408_vm0, %v1493_v7 }
  0x22   : > { %1408 = vmatmul.mubr.msk.bf16.gmra.mrb[8].mxu0 %vm408_vm0, %v1494_v8  ;;  %v1503_v8 = vld [vmem:[%s1784_s7] sm:$0xff]  }
  0x23   : > { %1411 = vmatprep.mubr.msk.bf16.mxu0 %vm408_vm0, %v1495_v9  ;;  %1459 = vmatprep.subr.bf16.mxu1 %v1503_v8  ;;  %v1321_v9 = vld [vmem:[%s1781_s4] ss:$0 sm:$0xff] }
  0x2a   : > { %1412 = vmatmul.mubr.msk.bf16.gmra.mrb[12].mxu0 %vm408_vm0, %v1496_v10 }
  0xe5   : > { %v1401_v16 = vpop.f32.mrb[0].mxu0 }
  0xe6   : > { %v476_v17 = vadd.f32 %v1401_v16, %v1303_v15  ;;  %v467_v18 = vpop.f32.mrb[1].mxu0 }
  0xe7   : > { %v468_v19 = vadd.f32 %v1303_v15, %v467_v18  ;;  %v1402_v20 = vpop.f32.mrb[2].mxu0 }
  0xe8   : > { %v479_v21 = vadd.f32 %v1402_v20, %v1303_v15  ;;  %v470_v22 = vpop.f32.mrb[3].mxu0  ;;  %v532_v24 = vmax.f32 %v476_v17, 0.0 }
  0xe9   : > { %v471_v23 = vadd.f32 %v1303_v15, %v470_v22  ;;  %v530_v26 = vmax.f32 %v468_v19, 0.0 }
  0xea   : > { %v533_v25 = vmax.f32 %v479_v21, 0.0 }
  0xeb   : > { %v531_v27 = vmax.f32 %v471_v23, 0.0 }
  0xec   : > { %v547_v28 = vpack.c.bf16 %v533_v25, %v532_v24 }
  0xed   : > { %v546_v29 = vpack.c.bf16 %v531_v27, %v530_v26  ;;  %v1405_v30 = vpop.f32.mrb[4].mxu0 }
  0xee   : > { %v492_v31 = vadd.f32 %v1405_v30, %v1303_v15  ;;  %v483_v32 = vpop.f32.mrb[5].mxu0 }
  0xef   : > { %1423 = vmatprep.mubr.msk.bf16.mxu1 %vm593_vm1, %v546_v29  ;;  %v484_v33 = vadd.f32 %v1303_v15, %v483_v32  ;;  %v1406_v34 = vpop.f32.mrb[6].mxu0 }
  0xf0   : > { %1424 = vmatmul.mubr.msk.bf16.vlgmr.msra.gmra.mrb[0].mxu1 %vm593_vm1, %v547_v28  ;;  %v536_v35 = vmax.f32 %v492_v31, 0.0  ;;  %v495_v36 = vadd.f32 %v1406_v34, %v1303_v15  ;;  %v486_v37 = vpop.f32.mrb[7].mxu0 }
  0xf1   : > { %v534_v38 = vmax.f32 %v484_v33, 0.0  ;;  %v487_v39 = vadd.f32 %v1303_v15, %v486_v37  ;;  %1460 = vmatpush3.bf16.msra.mxu1 %v1503_v8 }
  0xf2   : > { %v537_v40 = vmax.f32 %v495_v36, 0.0 }
  0xf3   : > { %v535_v41 = vmax.f32 %v487_v39, 0.0 }
  0xf4   : > { %v549_v42 = vpack.c.bf16 %v537_v40, %v536_v35 }
  0xf5   : > { %v548_v43 = vpack.c.bf16 %v535_v41, %v534_v38  ;;  %v1409_v44 = vpop.f32.mrb[8].mxu0 }
  0xf6   : > { %v508_v45 = vadd.f32 %v1409_v44, %v1303_v15  ;;  %v499_v46 = vpop.f32.mrb[9].mxu0 }
  0xf7   : > { %1427 = vmatprep.mubr.msk.bf16.mxu1 %vm593_vm1, %v548_v43  ;;  %v500_v47 = vadd.f32 %v1303_v15, %v499_v46  ;;  %v1410_v48 = vpop.f32.mrb[10].mxu0 }
  0xf8   : > { %1428 = vmatmul.mubr.msk.bf16.gmra.mrb[4].mxu1 %vm593_vm1, %v549_v42  ;;  %v540_v49 = vmax.f32 %v508_v45, 0.0  ;;  %v511_v50 = vadd.f32 %v1410_v48, %v1303_v15  ;;  %v502_v51 = vpop.f32.mrb[11].mxu0 }
  0xf9   : > { %v538_v52 = vmax.f32 %v500_v47, 0.0  ;;  %v503_v53 = vadd.f32 %v1303_v15, %v502_v51 }
  0xfa   : > { %v541_v54 = vmax.f32 %v511_v50, 0.0 }
  0xfb   : > { %v539_v55 = vmax.f32 %v503_v53, 0.0 }
  0xfc   : > { %v551_v56 = vpack.c.bf16 %v541_v54, %v540_v49 }
  0xfd   : > { %v550_v57 = vpack.c.bf16 %v539_v55, %v538_v52  ;;  %v1413_v58 = vpop.f32.mrb[12].mxu0 }
  0xfe   : > { %v524_v59 = vadd.f32 %v1413_v58, %v1303_v15  ;;  %v515_v60 = vpop.f32.mrb[13].mxu0 }
  0xff   : > { %1431 = vmatprep.mubr.msk.bf16.mxu1 %vm593_vm1, %v550_v57  ;;  %v516_v61 = vadd.f32 %v1303_v15, %v515_v60  ;;  %v1414_v62 = vpop.f32.mrb[14].mxu0 }
 0x100   : > { %1432 = vmatmul.mubr.msk.bf16.gmra.mrb[8].mxu1 %vm593_vm1, %v551_v56  ;;  %v544_v63 = vmax.f32 %v524_v59, 0.0  ;;  %v527_v0 = vadd.f32 %v1414_v62, %v1303_v15  ;;  %v518_v1 = vpop.f32.mrb[15].mxu0 }
 0x101   : > { %v542_v2 = vmax.f32 %v516_v61, 0.0  ;;  %v519_v3 = vadd.f32 %v1303_v15, %v518_v1 }
 0x102   : > { %v545_v4 = vmax.f32 %v527_v0, 0.0 }
 0x103   : > { %v543_v5 = vmax.f32 %v519_v3, 0.0 }
 0x104   : > { %v553_v6 = vpack.c.bf16 %v545_v4, %v544_v63 }
 0x105   : > { %v552_v7 = vpack.c.bf16 %v543_v5, %v542_v2  ;;  %v1334_v2 = vld [vmem:[%s1783_s6] ss:$0 sm:$0xff] }
 0x107   : > { %1435 = vmatprep.mubr.msk.bf16.mxu1 %vm593_vm1, %v552_v7 }
 0x108   : > { %1436 = vmatmul.mubr.msk.bf16.gmra.mrb[12].mxu1 %vm593_vm1, %v553_v6 }
 0x1c3   : > { %v1425_v10 = vpop.f32.mrb[0].mxu1 }
 0x1c4   : > { %v661_v11 = vadd.f32 %v1425_v10, %v1321_v9  ;;  %v652_v12 = vpop.f32.mrb[1].mxu1 }
 0x1c5   : > { %v653_v13 = vadd.f32 %v1321_v9, %v652_v12  ;;  %v1426_v14 = vpop.f32.mrb[2].mxu1 }
 0x1c6   : > { %v664_v15 = vadd.f32 %v1426_v14, %v1321_v9  ;;  %v655_v16 = vpop.f32.mrb[3].mxu1  ;;  %v717_v18 = vmax.f32 %v661_v11, 0.0 }
 0x1c7   : > { %v656_v17 = vadd.f32 %v1321_v9, %v655_v16  ;;  %v715_v20 = vmax.f32 %v653_v13, 0.0 }
 0x1c8   : > { %v718_v19 = vmax.f32 %v664_v15, 0.0 }
 0x1c9   : > { %v716_v21 = vmax.f32 %v656_v17, 0.0 }
 0x1ca   : > { %v732_v22 = vpack.c.bf16 %v718_v19, %v717_v18 }
 0x1cb   : > { %v731_v23 = vpack.c.bf16 %v716_v21, %v715_v20  ;;  %v1429_v24 = vpop.f32.mrb[4].mxu1 }
 0x1cc   : > { %v677_v25 = vadd.f32 %v1429_v24, %v1321_v9  ;;  %v668_v26 = vpop.f32.mrb[5].mxu1 }
 0x1cd   : > { %1443 = vmatprep.mubr.msk.bf16.mxu0 %vm762_vm2, %v731_v23  ;;  %v669_v27 = vadd.f32 %v1321_v9, %v668_v26  ;;  %v1430_v28 = vpop.f32.mrb[6].mxu1 }
 0x1ce   : > { %1444 = vmatmul.mubr.msk.bf16.vlgmr.msra.gmra.mrb[16].mxu0 %vm762_vm2, %v732_v22  ;;  %v721_v29 = vmax.f32 %v677_v25, 0.0  ;;  %v680_v30 = vadd.f32 %v1430_v28, %v1321_v9  ;;  %v671_v31 = vpop.f32.mrb[7].mxu1 }
 0x1cf   : > { %v719_v32 = vmax.f32 %v669_v27, 0.0  ;;  %v672_v33 = vadd.f32 %v1321_v9, %v671_v31 }
 0x1d0   : > { %v722_v34 = vmax.f32 %v680_v30, 0.0 }
 0x1d1   : > { %v720_v35 = vmax.f32 %v672_v33, 0.0 }
 0x1d2   : > { %v734_v36 = vpack.c.bf16 %v722_v34, %v721_v29 }
 0x1d3   : > { %v733_v37 = vpack.c.bf16 %v720_v35, %v719_v32  ;;  %v1433_v38 = vpop.f32.mrb[8].mxu1 }
 0x1d4   : > { %v693_v39 = vadd.f32 %v1433_v38, %v1321_v9  ;;  %v684_v40 = vpop.f32.mrb[9].mxu1 }
 0x1d5   : > { %1447 = vmatprep.mubr.msk.bf16.mxu0 %vm762_vm2, %v733_v37  ;;  %v685_v41 = vadd.f32 %v1321_v9, %v684_v40  ;;  %v1434_v42 = vpop.f32.mrb[10].mxu1 }
 0x1d6   : > { %1448 = vmatmul.mubr.msk.bf16.gmra.mrb[20].mxu0 %vm762_vm2, %v734_v36  ;;  %v725_v43 = vmax.f32 %v693_v39, 0.0  ;;  %v696_v44 = vadd.f32 %v1434_v42, %v1321_v9  ;;  %v687_v45 = vpop.f32.mrb[11].mxu1 }
 0x1d7   : > { %v723_v46 = vmax.f32 %v685_v41, 0.0  ;;  %v688_v47 = vadd.f32 %v1321_v9, %v687_v45 }
 0x1d8   : > { %v726_v48 = vmax.f32 %v696_v44, 0.0 }
 0x1d9   : > { %v724_v49 = vmax.f32 %v688_v47, 0.0 }
 0x1da   : > { %v736_v50 = vpack.c.bf16 %v726_v48, %v725_v43 }
 0x1db   : > { %v735_v51 = vpack.c.bf16 %v724_v49, %v723_v46  ;;  %v1437_v52 = vpop.f32.mrb[12].mxu1 }
 0x1dc   : > { %v709_v53 = vadd.f32 %v1437_v52, %v1321_v9  ;;  %v700_v54 = vpop.f32.mrb[13].mxu1 }
 0x1dd   : > { %1451 = vmatprep.mubr.msk.bf16.mxu0 %vm762_vm2, %v735_v51  ;;  %v701_v55 = vadd.f32 %v1321_v9, %v700_v54  ;;  %v1438_v56 = vpop.f32.mrb[14].mxu1 }
 0x1de   : > { %1452 = vmatmul.mubr.msk.bf16.gmra.mrb[24].mxu0 %vm762_vm2, %v736_v50  ;;  %v729_v57 = vmax.f32 %v709_v53, 0.0  ;;  %v712_v58 = vadd.f32 %v1438_v56, %v1321_v9  ;;  %v703_v59 = vpop.f32.mrb[15].mxu1 }
 0x1df   : > { %v727_v60 = vmax.f32 %v701_v55, 0.0  ;;  %v704_v61 = vadd.f32 %v1321_v9, %v703_v59  ;;  %v1512_v59 = vmov 4  }
 0x1e0   : > { %v730_v62 = vmax.f32 %v712_v58, 0.0  ;;  %1486 = vset.pattern.permute.xlu1 %v1512_v59  ;;  %1487 = vset.pattern.permute.xlu0 %v1512_v59 }
 0x1e1   : > { %v728_v63 = vmax.f32 %v704_v61, 0.0 }
 0x1e2   : > { %v738_v0 = vpack.c.bf16 %v730_v62, %v729_v57 }
 0x1e3   : > { %v737_v1 = vpack.c.bf16 %v728_v63, %v727_v60  ;;  %v1345_v60 = vld [vmem:[%s1785_s8] ss:$0 sm:$0xff] }
 0x1e5   : > { %1455 = vmatprep.mubr.msk.bf16.mxu0 %vm762_vm2, %v737_v1 }
 0x1e6   : > { %1456 = vmatmul.mubr.msk.bf16.gmra.mrb[28].mxu0 %vm762_vm2, %v738_v0 }
 0x2a1   : > { %v1445_v3 = vpop.f32.mrb[16].mxu0 }
 0x2a2   : > { %v830_v4 = vadd.f32 %v1445_v3, %v1334_v2  ;;  %v821_v5 = vpop.f32.mrb[17].mxu0 }
 0x2a3   : > { %v822_v6 = vadd.f32 %v1334_v2, %v821_v5  ;;  %v1446_v7 = vpop.f32.mrb[18].mxu0 }
 0x2a4   : > { %v833_v8 = vadd.f32 %v1446_v7, %v1334_v2  ;;  %v824_v10 = vpop.f32.mrb[19].mxu0  ;;  %v886_v11 = vmax.f32 %v830_v4, 0.0 }
 0x2a5   : > { %v825_v9 = vadd.f32 %v1334_v2, %v824_v10  ;;  %v884_v13 = vmax.f32 %v822_v6, 0.0 }
 0x2a6   : > { %v887_v12 = vmax.f32 %v833_v8, 0.0 }
 0x2a7   : > { %v885_v14 = vmax.f32 %v825_v9, 0.0 }
 0x2a8   : > { %v901_v15 = vpack.c.bf16 %v887_v12, %v886_v11 }
 0x2a9   : > { %v900_v16 = vpack.c.bf16 %v885_v14, %v884_v13  ;;  %v1449_v17 = vpop.f32.mrb[20].mxu0 }
 0x2aa   : > { %v846_v18 = vadd.f32 %v1449_v17, %v1334_v2  ;;  %v837_v19 = vpop.f32.mrb[21].mxu0 }
 0x2ab   : > { %1461 = vmatprep.mubr.msk.bf16.mxu1 %vm408_vm0, %v900_v16  ;;  %v838_v20 = vadd.f32 %v1334_v2, %v837_v19  ;;  %v1450_v21 = vpop.f32.mrb[22].mxu0 }
 0x2ac   : > { %1462 = vmatmul.mubr.msk.bf16.vlgmr.msra.gmra.mrb[16].mxu1 %vm408_vm0, %v901_v15  ;;  %v890_v22 = vmax.f32 %v846_v18, 0.0  ;;  %v849_v23 = vadd.f32 %v1450_v21, %v1334_v2  ;;  %v840_v24 = vpop.f32.mrb[23].mxu0 }
 0x2ad   : > { %v888_v25 = vmax.f32 %v838_v20, 0.0  ;;  %v841_v26 = vadd.f32 %v1334_v2, %v840_v24 }
 0x2ae   : > { %v891_v27 = vmax.f32 %v849_v23, 0.0 }
 0x2af   : > { %v889_v28 = vmax.f32 %v841_v26, 0.0 }
 0x2b0   : > { %v903_v29 = vpack.c.bf16 %v891_v27, %v890_v22 }
 0x2b1   : > { %v902_v30 = vpack.c.bf16 %v889_v28, %v888_v25  ;;  %v1453_v31 = vpop.f32.mrb[24].mxu0 }
 0x2b2   : > { %v862_v32 = vadd.f32 %v1453_v31, %v1334_v2  ;;  %v853_v33 = vpop.f32.mrb[25].mxu0 }
 0x2b3   : > { %1465 = vmatprep.mubr.msk.bf16.mxu1 %vm408_vm0, %v902_v30  ;;  %v854_v34 = vadd.f32 %v1334_v2, %v853_v33  ;;  %v1454_v35 = vpop.f32.mrb[26].mxu0 }
 0x2b4   : > { %1466 = vmatmul.mubr.msk.bf16.gmra.mrb[20].mxu1 %vm408_vm0, %v903_v29  ;;  %v894_v36 = vmax.f32 %v862_v32, 0.0  ;;  %v865_v37 = vadd.f32 %v1454_v35, %v1334_v2  ;;  %v856_v38 = vpop.f32.mrb[27].mxu0 }
 0x2b5   : > { %v892_v39 = vmax.f32 %v854_v34, 0.0  ;;  %v857_v40 = vadd.f32 %v1334_v2, %v856_v38 }
 0x2b6   : > { %v895_v41 = vmax.f32 %v865_v37, 0.0 }
 0x2b7   : > { %v893_v42 = vmax.f32 %v857_v40, 0.0 }
 0x2b8   : > { %v905_v43 = vpack.c.bf16 %v895_v41, %v894_v36 }
 0x2b9   : > { %v904_v44 = vpack.c.bf16 %v893_v42, %v892_v39  ;;  %v1457_v45 = vpop.f32.mrb[28].mxu0 }
 0x2ba   : > { %v878_v46 = vadd.f32 %v1457_v45, %v1334_v2  ;;  %v869_v47 = vpop.f32.mrb[29].mxu0 }
 0x2bb   : > { %1469 = vmatprep.mubr.msk.bf16.mxu1 %vm408_vm0, %v904_v44  ;;  %v870_v48 = vadd.f32 %v1334_v2, %v869_v47  ;;  %v1458_v49 = vpop.f32.mrb[30].mxu0 }
 0x2bc   : > { %1470 = vmatmul.mubr.msk.bf16.gmra.mrb[24].mxu1 %vm408_vm0, %v905_v43  ;;  %v898_v50 = vmax.f32 %v878_v46, 0.0  ;;  %v881_v51 = vadd.f32 %v1458_v49, %v1334_v2  ;;  %v872_v52 = vpop.f32.mrb[31].mxu0 }
 0x2bd   : > { %v896_v53 = vmax.f32 %v870_v48, 0.0  ;;  %v873_v54 = vadd.f32 %v1334_v2, %v872_v52 }
 0x2be   : > { %v899_v55 = vmax.f32 %v881_v51, 0.0 }
 0x2bf   : > { %v897_v56 = vmax.f32 %v873_v54, 0.0 }
 0x2c0   : > { %v907_v57 = vpack.c.bf16 %v899_v55, %v898_v50 }
 0x2c1   : > { %v906_v58 = vpack.c.bf16 %v897_v56, %v896_v53 }
 0x2c3   : > { %1473 = vmatprep.mubr.msk.bf16.mxu1 %vm408_vm0, %v906_v58 }
 0x2c4   : > { %1474 = vmatmul.mubr.msk.bf16.gmra.mrb[28].mxu1 %vm408_vm0, %v907_v57 }
 0x37f   : > { %v1463_v61 = vpop.f32.mrb[16].mxu1 }
 0x380   : > { %v1645_v62 = vadd.f32 %v1463_v61, %v1345_v60  ;;  %v981_v63 = vpop.f32.mrb[17].mxu1 }
 0x381   : > { %v1647_v0 = vadd.f32 %v1345_v60, %v981_v63  ;;  %v1464_v1 = vpop.f32.mrb[18].mxu1 }
 0x382   : > { %1138 = vperm.xlu1 %1486, %v1645_v62   ;;  %v984_v2 = vpop.f32.mrb[19].mxu1  ;;  %v1051_v22 = vsel %vm1044_vm3, %v1645_v62, 0.0  ;;  %v993_v31 = vadd.f32 %v1464_v1, %v1345_v60 }
 0x383   : > { %1128 = vperm.xlu0 %1487, %v1647_v0   ;;  %v1663_v19 = vadd.f32 %v1345_v60, %v984_v2  ;;  %v1045_v20 = vsel %vm1044_vm3, %v1647_v0, 0.0 }
 0x384   : > { %v1054_v36 = vsel %vm1044_vm3, %v993_v31, 0.0 }
 0x385   : > { %v1048_v23 = vsel %vm1044_vm3, %v1663_v19, 0.0 }
 0x387   : > { %v1467_v3 = vpop.f32.mrb[20].mxu1 }
 0x388   : > { %v997_v4 = vpop.f32.mrb[21].mxu1  ;;  %v1667_v21 = vadd.f32 %v1467_v3, %v1345_v60 }
 0x389   : > { %v1468_v5 = vpop.f32.mrb[22].mxu1  ;;  %v1673_v24 = vadd.f32 %v1345_v60, %v997_v4 }
 0x38a   : > { %v1651_v6 = vadd.f32 %v1468_v5, %v1345_v60  ;;  %v1000_v7 = vpop.f32.mrb[23].mxu1  ;;  %v1063_v25 = vsel %vm1044_vm3, %v1667_v21, 0.0 }
 0x38b   : > { %v1653_v8 = vadd.f32 %v1345_v60, %v1000_v7  ;;  %v1057_v26 = vsel %vm1044_vm3, %v1673_v24, 0.0 }
 0x38c   : > { %v1066_v39 = vsel %vm1044_vm3, %v1651_v6, 0.0 }
 0x38d   : > { %v1060_v50 = vsel %vm1044_vm3, %v1653_v8, 0.0 }
 0x38f   : > { %v1471_v10 = vpop.f32.mrb[24].mxu1 }
 0x390   : > { %v1013_v9 = vpop.f32.mrb[25].mxu1  ;;  %v1679_v27 = vadd.f32 %v1471_v10, %v1345_v60 }
 0x391   : > { %v1472_v11 = vpop.f32.mrb[26].mxu1  ;;  %v1681_v28 = vadd.f32 %v1345_v60, %v1013_v9 }
 0x392   : > { %v1655_v12 = vadd.f32 %v1472_v11, %v1345_v60  ;;  %v1016_v13 = vpop.f32.mrb[27].mxu1  ;;  %v1075_v29 = vsel %vm1044_vm3, %v1679_v27, 0.0 }
 0x393   : > { %v1657_v14 = vadd.f32 %v1345_v60, %v1016_v13  ;;  %v1069_v30 = vsel %vm1044_vm3, %v1681_v28, 0.0 }
 0x394   : > { %v1078_v10 = vsel %vm1044_vm3, %v1655_v12, 0.0 }
 0x395   : > { %v1072_v9 = vsel %vm1044_vm3, %v1657_v14, 0.0 }
 0x397   : > { %v1475_v15 = vpop.f32.mrb[28].mxu1 }
 0x398   : > { %v1659_v16 = vadd.f32 %v1475_v15, %v1345_v60  ;;  %v1029_v17 = vpop.f32.mrb[29].mxu1 }
 0x399   : > { %v1661_v18 = vadd.f32 %v1345_v60, %v1029_v17  ;;  %v1476_v32 = vpop.f32.mrb[30].mxu1 }
 0x39a   : > { %v1687_v33 = vadd.f32 %v1476_v32, %v1345_v60  ;;  %v1032_v34 = vpop.f32.mrb[31].mxu1  ;;  %v1087_v37 = vsel %vm1044_vm3, %v1659_v16, 0.0 }
 0x39b   : > { %v1689_v35 = vadd.f32 %v1345_v60, %v1032_v34  ;;  %v1081_v38 = vsel %vm1044_vm3, %v1661_v18, 0.0 }
 0x3a2   : > { %1046 = vadd.xlane.f32.xlu0 %v1045_v20  ;;  %v1090_v20 = vsel %vm1044_vm3, %v1687_v33, 0.0 }
 0x3a6   : > { %1052 = vadd.xlane.f32.xlu1 %v1051_v22  ;;  %1049 = vadd.xlane.f32.xlu0 %v1048_v23 }
 0x3aa   : > { %1064 = vadd.xlane.f32.xlu0 %v1063_v25 }
 0x3ae   : > { %1058 = vadd.xlane.f32.xlu0 %v1057_v26 }
 0x3b2   : > { %1076 = vadd.xlane.f32.xlu0 %v1075_v29 }
 0x3b6   : > { %1070 = vadd.xlane.f32.xlu0 %v1069_v30 }
 0x3b7   : > { %1143 = vperm.xlu1 %1486, %v993_v31  }
 0x3cc   : > { %1183 = vperm.xlu0 %1487, %v1655_v12  }
 0x3d0   : > { %1173 = vperm.xlu0 %1487, %v1657_v14  }
 0x3db   : > { %1055 = vadd.xlane.f32.xlu1 %v1054_v36 }
 0x3ec   : > { %1133 = vperm.xlu1 %1486, %v1663_v19  }
 0x3ef   : > { %1088 = vadd.xlane.f32.xlu0 %v1087_v37 }
 0x3f0   : > { %1158 = vperm.xlu1 %1486, %v1667_v21  }
 0x3f3   : > { %1082 = vadd.xlane.f32.xlu0 %v1081_v38 }
 0x3f4   : > { %1148 = vperm.xlu1 %1486, %v1673_v24  }
 0x3f8   : > { %1163 = vperm.xlu1 %1486, %v1651_v6  }
 0x401   : > { %v1139_v41 = vpop.permute.xlu1 %1138 }
 0x402   : > { %v1129_v40 = vpop.permute.xlu0 %1128 }
 0x409   : > { %1193 = vperm.xlu0 %1487, %v1689_v35  }
 0x40d   : > { %1203 = vperm.xlu0 %1487, %v1687_v33  }
 0x41c   : > { %1067 = vadd.xlane.f32.xlu1 %v1066_v39 }
 0x42d   : > { %1153 = vperm.xlu1 %1486, %v1653_v8  }
 0x42f   : > { %v1047_v42 = vpop.xlane.xlu0 %1046 }
 0x430   : > { %v1094_v43 = vmul.f32 0.25, %v1047_v42 }
 0x432   : > { %v1110_v44 = vsub.f32 %v1647_v0, %v1094_v43 }
 0x433   : > { %v1053_v45 = vpop.xlane.xlu1 %1052  ;;  %v1050_v51 = vpop.xlane.xlu0 %1049 }
 0x434   : > { %v1206_v46 = vadd.f32 %v1129_v40, %v1110_v44  ;;  %v1096_v47 = vmul.f32 0.25, %v1053_v45  ;;  %v1095_v54 = vmul.f32 0.25, %v1050_v51 }
 0x436   : > { %1222 = vst.msk [vmem:[%s1712_s24] sm:$0xff] %vm1044_vm3, %v1206_v46  ;;  %v1112_v48 = vsub.f32 %v1645_v62, %v1096_v47  ;;  %v1111_v59 = vsub.f32 %v1663_v19, %v1095_v54 }
 0x437   : > { %v1144_v52 = vpop.permute.xlu1 %1143  ;;  %v1065_v53 = vpop.xlane.xlu0 %1064 }
 0x438   : > { %v1208_v49 = vadd.f32 %v1139_v41, %v1112_v48  ;;  %v1100_v57 = vmul.f32 0.25, %v1065_v53 }
 0x43a   : > { %1224 = vst.msk [vmem:[%s1712_s24 + $0x10] sm:$0xff] %vm1044_vm3, %v1208_v49  ;;  %v1116_v1 = vsub.f32 %v1667_v21, %v1100_v57  ;;  %v1084_v21 = vsel %vm1044_vm3, %v1689_v35, 0.0 }
 0x43b   : > { %v1059_v60 = vpop.xlane.xlu0 %1058 }
 0x43c   : > { %v1098_v0 = vmul.f32 0.25, %v1059_v60 }
 0x43e   : > { %v1114_v4 = vsub.f32 %v1673_v24, %v1098_v0 }
 0x43f   : > { %v1077_v22 = vpop.xlane.xlu0 %1076 }
 0x440   : > { %v1104_v24 = vmul.f32 0.25, %v1077_v22 }
 0x451   : > { %1061 = vadd.xlane.f32.xlu1 %v1060_v50 }
 0x462   : > { %1178 = vperm.xlu1 %1486, %v1679_v27  }
 0x466   : > { %1168 = vperm.xlu1 %1486, %v1681_v28  }
 0x468   : > { %v1056_v55 = vpop.xlane.xlu1 %1055 }
 0x469   : > { %v1097_v56 = vmul.f32 0.25, %v1056_v55 }
 0x46b   : > { %v1113_v58 = vsub.f32 %v993_v31, %v1097_v56  ;;  %v1120_v31 = vsub.f32 %v1679_v27, %v1104_v24 }
 0x46c   : > { %v1134_v61 = vpop.permute.xlu1 %1133 }
 0x46d   : > { %v1209_v62 = vadd.f32 %v1144_v52, %v1113_v58  ;;  %v1207_v63 = vadd.f32 %v1134_v61, %v1111_v59 }
 0x46f   : > { %1225 = vst.msk [vmem:[%s1712_s24 + $0x18] sm:$0xff] %vm1044_vm3, %v1209_v62  ;;  %1223 = vst.msk [vmem:[%s1712_s24 + $0x8] sm:$0xff] %vm1044_vm3, %v1207_v63 }
 0x470   : > { %v1159_v2 = vpop.permute.xlu1 %1158 }
 0x471   : > { %v1212_v3 = vadd.f32 %v1159_v2, %v1116_v1 }
 0x473   : > { %1228 = vst.msk [vmem:[%s1712_s24 + $0x30] sm:$0xff] %vm1044_vm3, %v1212_v3 }
 0x474   : > { %v1149_v5 = vpop.permute.xlu1 %1148 }
 0x475   : > { %v1210_v7 = vadd.f32 %v1149_v5, %v1114_v4 }
 0x477   : > { %1226 = vst.msk [vmem:[%s1712_s24 + $0x20] sm:$0xff] %vm1044_vm3, %v1210_v7 }
 0x478   : > { %v1164_v11 = vpop.permute.xlu1 %1163 }
 0x48a   : > { %1079 = vadd.xlane.f32.xlu1 %v1078_v10 }
 0x48e   : > { %1073 = vadd.xlane.f32.xlu1 %v1072_v9 }
 0x49f   : > { %1188 = vperm.xlu1 %1486, %v1661_v18  }
 0x4a9   : > { %v1068_v13 = vpop.xlane.xlu1 %1067 }
 0x4aa   : > { %v1101_v15 = vmul.f32 0.25, %v1068_v13 }
 0x4ac   : > { %v1117_v17 = vsub.f32 %v1651_v6, %v1101_v15  ;;  %v1071_v6 = vpop.xlane.xlu0 %1070 }
 0x4ad   : > { %v1154_v23 = vpop.permute.xlu1 %1153  ;;  %v1102_v29 = vmul.f32 0.25, %v1071_v6 }
 0x4ae   : > { %v1213_v19 = vadd.f32 %v1164_v11, %v1117_v17 }
 0x4af   : > { %v1118_v37 = vsub.f32 %v1681_v28, %v1102_v29 }
 0x4b0   : > { %1229 = vst.msk [vmem:[%s1712_s24 + $0x38] sm:$0xff] %vm1044_vm3, %v1213_v19  ;;  %v1184_v40 = vpop.permute.xlu0 %1183 }
 0x4b4   : > { %v1174_v41 = vpop.permute.xlu0 %1173 }
 0x4c3   : > { %1091 = vadd.xlane.f32.xlu1 %v1090_v20 }
 0x4c7   : > { %1085 = vadd.xlane.f32.xlu1 %v1084_v21 }
 0x4d8   : > { %1198 = vperm.xlu1 %1486, %v1659_v16  }
 0x4de   : > { %v1062_v25 = vpop.xlane.xlu1 %1061 }
 0x4df   : > { %v1099_v26 = vmul.f32 0.25, %v1062_v25 }
 0x4e1   : > { %v1115_v30 = vsub.f32 %v1653_v8, %v1099_v26  ;;  %v1089_v8 = vpop.xlane.xlu0 %1088 }
 0x4e2   : > { %v1179_v32 = vpop.permute.xlu1 %1178  ;;  %v1108_v55 = vmul.f32 0.25, %v1089_v8 }
 0x4e3   : > { %v1211_v34 = vadd.f32 %v1154_v23, %v1115_v30  ;;  %v1216_v36 = vadd.f32 %v1179_v32, %v1120_v31 }
 0x4e4   : > { %v1124_v60 = vsub.f32 %v1659_v16, %v1108_v55 }
 0x4e5   : > { %1227 = vst.msk [vmem:[%s1712_s24 + $0x28] sm:$0xff] %vm1044_vm3, %v1211_v34  ;;  %1232 = vst.msk [vmem:[%s1712_s24 + $0x50] sm:$0xff] %vm1044_vm3, %v1216_v36  ;;  %v1083_v27 = vpop.xlane.xlu0 %1082 }
 0x4e6   : > { %v1169_v38 = vpop.permute.xlu1 %1168  ;;  %v1106_v44 = vmul.f32 0.25, %v1083_v27 }
 0x4e7   : > { %v1214_v39 = vadd.f32 %v1169_v38, %v1118_v37 }
 0x4e8   : > { %v1122_v49 = vsub.f32 %v1661_v18, %v1106_v44 }
 0x4e9   : > { %1230 = vst.msk [vmem:[%s1712_s24 + $0x40] sm:$0xff] %vm1044_vm3, %v1214_v39  ;;  %v1194_v53 = vpop.permute.xlu0 %1193 }
 0x4ed   : > { %v1204_v57 = vpop.permute.xlu0 %1203 }
 0x517   : > { %v1080_v42 = vpop.xlane.xlu1 %1079 }
 0x518   : > { %v1105_v43 = vmul.f32 0.25, %v1080_v42 }
 0x51a   : > { %v1121_v45 = vsub.f32 %v1655_v12, %v1105_v43 }
 0x51b   : > { %v1074_v46 = vpop.xlane.xlu1 %1073 }
 0x51c   : > { %v1217_v47 = vadd.f32 %v1184_v40, %v1121_v45  ;;  %v1103_v48 = vmul.f32 0.25, %v1074_v46 }
 0x51e   : > { %1233 = vst.msk [vmem:[%s1712_s24 + $0x58] sm:$0xff] %vm1044_vm3, %v1217_v47  ;;  %v1119_v28 = vsub.f32 %v1657_v14, %v1103_v48 }
 0x51f   : > { %v1189_v50 = vpop.permute.xlu1 %1188 }
 0x520   : > { %v1215_v51 = vadd.f32 %v1174_v41, %v1119_v28  ;;  %v1218_v52 = vadd.f32 %v1189_v50, %v1122_v49 }
 0x522   : > { %1231 = vst.msk [vmem:[%s1712_s24 + $0x48] sm:$0xff] %vm1044_vm3, %v1215_v51  ;;  %1234 = vst.msk [vmem:[%s1712_s24 + $0x60] sm:$0xff] %vm1044_vm3, %v1218_v52 }
 0x550   : > { %v1092_v12 = vpop.xlane.xlu1 %1091 }
 0x551   : > { %v1109_v54 = vmul.f32 0.25, %v1092_v12 }
 0x553   : > { %v1125_v56 = vsub.f32 %v1687_v33, %v1109_v54 }
 0x554   : > { %v1086_v14 = vpop.xlane.xlu1 %1085 }
 0x555   : > { %v1221_v58 = vadd.f32 %v1204_v57, %v1125_v56  ;;  %v1107_v59 = vmul.f32 0.25, %v1086_v14 }
 0x557   : > { %1237 = vst.msk [vmem:[%s1712_s24 + $0x78] sm:$0xff] %vm1044_vm3, %v1221_v58  ;;  %v1123_v18 = vsub.f32 %v1689_v35, %v1107_v59 }
 0x558   : > { %v1199_v61 = vpop.permute.xlu1 %1198 }
 0x559   : > { %v1219_v62 = vadd.f32 %v1194_v53, %v1123_v18  ;;  %v1220_v63 = vadd.f32 %v1199_v61, %v1124_v60 }
 0x55b   : > { %1235 = vst.msk [vmem:[%s1712_s24 + $0x68] sm:$0xff] %vm1044_vm3, %v1219_v62  ;;  %1236 = vst.msk [vmem:[%s1712_s24 + $0x70] sm:$0xff] %vm1044_vm3, %v1220_v63 }
 0x55c PF: > { %s19_s30 = sadd.s32 1, %s1510_s30  }
 0x55d   : > { %p16_p4 = scmp.ge.s32.totalorder %s19_s30, 4  }
 0x55f   :  { %18 = sbr.rel (!%p16_p4) target bundleno = 1 (0x1), region = 86 }

</bundles_post_ra>
